<compile_context>
chip_gen: v7x
topology: tpu7x:2x2x1
jax: 0.10.0
libtpu: 0.0.40
codegen_flags: <defaults>
</compile_context>

<pallas_src>
import functools

import jax
import jax.numpy as jnp
from jax import lax
from jax.experimental import pallas as pl
from jax.experimental.pallas import tpu as pltpu

_LANE = 128
_EPS = 1e-6
_CHUNK = 1024  # rows per in-kernel compute chunk (multiple of 8)


def _tpu_generation():
    try:
        kind = jax.devices()[0].device_kind.lower()
    except Exception:
        return 6
    for g in (7, 6, 5, 4, 3, 2):
        if (f"v{g}" in kind) or (f"tpu{g}" in kind):
            return g
    return 6


_GEN = _tpu_generation()
if _GEN >= 6:
    _TM_TARGET = 8192            # 3 inputs x 2 bufs x 4 MiB = 24 MiB (f32)
    _VMEM_LIMIT = 40 << 20       # safe on v7x (64 MiB physical) and v6e
else:
    _TM_TARGET = 4096            # 12 MiB of double-buffered input blocks
    _VMEM_LIMIT = 28 << 20       # v5e scoped default (16 MiB) is too tight
_NUM_PARTS_HW = 2 if _GEN >= 7 else 1  # 2 TensorCores only on v7x


def _triplet_kernel(a_ref, p_ref, n_ref, out_ref, accp_ref, accn_ref,
                    *, rows, tm, chunk, need_mask, acc8):
    s = pl.program_id(1)

    # Reset the per-part accumulators at the start of each part's step loop.
    @pl.when(s == 0)
    def _():
        accp_ref[...] = jnp.zeros_like(accp_ref)
        accn_ref[...] = jnp.zeros_like(accn_ref)

    # Nominal block index (NOT clamped) so fully out-of-range dummy blocks of an
    # uneven part split contribute exactly zero through the row mask.
    blk = pl.program_id(0) * pl.num_programs(1) + s
    base_row = blk * tm

    def accum_chunk(off, cr, masked):
        # off: chunk start row within this block; cr: static chunk row count.
        a = a_ref[pl.ds(off, cr), :].astype(jnp.float32)
        dp = a - p_ref[pl.ds(off, cr), :].astype(jnp.float32)
        dn = a - n_ref[pl.ds(off, cr), :].astype(jnp.float32)
        dp2 = dp * dp
        dn2 = dn * dn
        if masked:
            rid = base_row + off + lax.broadcasted_iota(jnp.int32, (cr, _LANE), 0)
            valid = rid < rows
            # select (not multiply) so OOB garbage / NaN never leaks into sums.
            dp2 = jnp.where(valid, dp2, 0.0)
            dn2 = jnp.where(valid, dn2, 0.0)
        if acc8:
            # Pure vreg adds: (cr//8, 8, 128) sum over axis 0, no XLU reduce.
            accp_ref[...] += jnp.sum(dp2.reshape(cr // 8, 8, _LANE), axis=0)
            accn_ref[...] += jnp.sum(dn2.reshape(cr // 8, 8, _LANE), axis=0)
        else:
            # Small single-block path where tm % 8 != 0.
            accp_ref[0:1, :] += jnp.sum(dp2, axis=0, keepdims=True)
            accn_ref[0:1, :] += jnp.sum(dn2, axis=0, keepdims=True)

    def accumulate(masked):
        n_full, rem = divmod(tm, chunk)
        if n_full == 1 and rem == 0:
            accum_chunk(0, tm, masked)
            return
        if n_full:
            def body(c, carry):
                accum_chunk(pl.multiple_of(c * chunk, chunk), chunk, masked)
                return carry
            lax.fori_loop(0, n_full, body, 0, unroll=True)
        if rem:
            accum_chunk(n_full * chunk, rem, masked)

    if need_mask:
        # Only edge / dummy blocks pay for iota + compare + selects.
        @pl.when(base_row + tm <= rows)
        def _():
            accumulate(False)

        @pl.when(base_row + tm > rows)
        def _():
            accumulate(True)
    else:
        accumulate(False)

    # Per-part epilogue: dump the lane-partial accumulators (lane-dense output).
    @pl.when(s == pl.num_programs(1) - 1)
    def _():
        out_ref[0, 0:8, :] = accp_ref[...]
        out_ref[0, 8:16, :] = accn_ref[...]


@functools.partial(jax.jit, static_argnames=("margin",))
def triplet_loss_mean(anchor, positive, negative, margin=1.0):
    assert anchor.shape == positive.shape == negative.shape
    n_elems = anchor.size
    n_bulk = (n_elems // _LANE) * _LANE
    n_tail = n_elems - n_bulk

    a_flat = anchor.reshape(-1)
    p_flat = positive.reshape(-1)
    n_flat = negative.reshape(-1)

    dp_sum = jnp.float32(0.0)
    dn_sum = jnp.float32(0.0)

    # Fold the (<128-element) non-lane-aligned tail in with plain XLA — no
    # full-array jnp.pad copy just to add a handful of elements.
    if n_tail:
        at = a_flat[n_bulk:].astype(jnp.float32)
        pt = p_flat[n_bulk:].astype(jnp.float32)
        nt = n_flat[n_bulk:].astype(jnp.float32)
        dp_sum = dp_sum + jnp.sum((at - pt) ** 2)
        dn_sum = dn_sum + jnp.sum((at - nt) ** 2)

    if n_bulk:
        rows = n_bulk // _LANE
        if n_tail:
            a2 = a_flat[:n_bulk].reshape(rows, _LANE)
            p2 = p_flat[:n_bulk].reshape(rows, _LANE)
            n2 = n_flat[:n_bulk].reshape(rows, _LANE)
        else:
            a2 = a_flat.reshape(rows, _LANE)
            p2 = p_flat.reshape(rows, _LANE)
            n2 = n_flat.reshape(rows, _LANE)

        # Row tile: full slab when small, otherwise a large generation-sized tile.
        tm = rows if rows <= _TM_TARGET else _TM_TARGET
        total_blocks = pl.cdiv(rows, tm)

        # Split the block range over 2 "parallel" parts only on v7x (2 TCs).
        num_parts = _NUM_PARTS_HW if total_blocks >= _NUM_PARTS_HW else 1
        steps = pl.cdiv(total_blocks, num_parts)
        need_mask = (num_parts * steps * tm != rows)
        clamp_needed = (num_parts * steps != total_blocks)
        acc8 = (tm % 8 == 0)
        chunk = min(tm, _CHUNK)

        if clamp_needed:
            # Keep the DMA in-bounds for the trailing dummy block of an odd
            # split; its contribution is zeroed by the in-kernel row mask.
            def in_map(p, s):
                return (jnp.minimum(p * steps + s, total_blocks - 1), 0)
        else:
            def in_map(p, s):
                return (p * steps + s, 0)

        in_spec = pl.BlockSpec((tm, _LANE), in_map)
        out_spec = pl.BlockSpec((1, 16, _LANE), lambda p, s: (p, 0, 0))

        kern = functools.partial(_triplet_kernel, rows=rows, tm=tm, chunk=chunk,
                                 need_mask=need_mask, acc8=acc8)

        partials = pl.pallas_call(
            kern,
            out_shape=jax.ShapeDtypeStruct((num_parts, 16, _LANE), jnp.float32),
            grid_spec=pltpu.PrefetchScalarGridSpec(
                num_scalar_prefetch=0,
                grid=(num_parts, steps),
                in_specs=[in_spec, in_spec, in_spec],
                out_specs=out_spec,
                scratch_shapes=[
                    pltpu.VMEM((8, _LANE), jnp.float32),  # per-lane sum (a-p)^2
                    pltpu.VMEM((8, _LANE), jnp.float32),  # per-lane sum (a-n)^2
                ],
            ),
            compiler_params=pltpu.CompilerParams(
                dimension_semantics=("parallel", "arbitrary"),
                vmem_limit_bytes=_VMEM_LIMIT,
            ),
        )(a2, p2, n2)

        # Final cross-sublane/lane reduction of the tiny partial slabs in XLA.
        dp_sum = dp_sum + jnp.sum(partials[:, 0:8, :])
        dn_sum = dn_sum + jnp.sum(partials[:, 8:16, :])

    inv_n = 1.0 / float(n_elems)
    dp_mean = dp_sum * inv_n
    dn_mean = dn_sum * inv_n
    loss = jnp.maximum(dp_mean - dn_mean + float(margin), _EPS)
    return loss


def _reference(anchor, positive, negative, margin=1.0):
    dp = jnp.mean((anchor.astype(jnp.float32) - positive.astype(jnp.float32)) ** 2)
    dn = jnp.mean((anchor.astype(jnp.float32) - negative.astype(jnp.float32)) ** 2)
    return jnp.maximum(dp - dn + margin, _EPS)


def _run_case(shape, margin=1.0, tol=1e-4):
    k1, k2, k3 = jax.random.split(jax.random.PRNGKey(0), 3)
    anchor = jax.random.normal(k1, shape, dtype=jnp.float32)
    positive = jax.random.normal(k2, shape, dtype=jnp.float32)
    negative = jax.random.normal(k3, shape, dtype=jnp.float32)

    loss = triplet_loss_mean(anchor, positive, negative, margin=margin)
    jax.block_until_ready(loss)

    ref = _reference(anchor, positive, negative, margin=margin)
    assert jnp.allclose(loss, ref, atol=tol, rtol=tol), (shape, loss, ref)


if __name__ == "__main__":
    # Small NCHW-style feature maps (single-block, lane-aligned path).
    _run_case((2, 4, 16, 16))
    # Moderate case: single block, chunked compute with a remainder chunk.
    _run_case((2, 64, 48, 48))
    # Non-lane-aligned element count: exercises the XLA tail + (1,128)-acc path.
    _run_case((3, 5, 7, 11))
    # Multi-block case: exercises the masked edge block (and 2-part split on v7x).
    _run_case((2, 64, 96, 96), tol=5e-4)
    print("KERNEL_OK")
</pallas_src>

<mosaic_0001>
module attributes {stable_mosaic.version = 11 : i64} {
  func.func @_triplet_kernel(%arg0: i32, %arg1: i32, %arg2: memref<16x128xf32, #tpu.memory_space<vmem>>, %arg3: memref<16x128xf32, #tpu.memory_space<vmem>>, %arg4: memref<16x128xf32, #tpu.memory_space<vmem>>, %arg5: memref<1x16x128xf32, #tpu.memory_space<vmem>>, %arg6: memref<8x128xf32, #tpu.memory_space<vmem>>, %arg7: memref<8x128xf32, #tpu.memory_space<vmem>>) attributes {dimension_semantics = [#tpu.dimension_semantics<parallel>, #tpu.dimension_semantics<arbitrary>], iteration_bounds = array<i64: 1, 1>, scalar_prefetch = 0 : i64, scratch_operands = 2 : i64, tpu.core_type = #tpu.core_type<tc>, window_params = [{transform_indices = @transform_0, window_bounds = array<i64: 16, 128>}, {transform_indices = @transform_1, window_bounds = array<i64: 16, 128>}, {transform_indices = @transform_2, window_bounds = array<i64: 16, 128>}, {transform_indices = @transform_3, window_bounds = array<i64: 1, 16, 128>}]} {
    %c0_i32 = arith.constant 0 : i32
    %0 = arith.cmpi eq, %arg1, %c0_i32 : i32
    %1 = arith.extui %0 : i1 to i32
    %c0_i32_0 = arith.constant 0 : i32
    %2 = arith.cmpi ne, %1, %c0_i32_0 : i32
    scf.if %2 {
      %cst_17 = arith.constant 0.000000e+00 : f32
      %23 = vector.broadcast %cst_17 : f32 to vector<8x128xf32>
      %c0_18 = arith.constant 0 : index
      %c0_19 = arith.constant 0 : index
      %24 = vector.load %arg6[%c0_18, %c0_19] : memref<8x128xf32, #tpu.memory_space<vmem>>, vector<8x128xf32>
      tpu.vector_store %arg6[%c0_18, %c0_19], %23 {strides = array<i32>} : memref<8x128xf32, #tpu.memory_space<vmem>>, vector<8x128xf32>,
      %cst_20 = arith.constant 0.000000e+00 : f32
      %25 = vector.broadcast %cst_20 : f32 to vector<8x128xf32>
      %c0_21 = arith.constant 0 : index
      %c0_22 = arith.constant 0 : index
      %26 = vector.load %arg7[%c0_21, %c0_22] : memref<8x128xf32, #tpu.memory_space<vmem>>, vector<8x128xf32>
      tpu.vector_store %arg7[%c0_21, %c0_22], %25 {strides = array<i32>} : memref<8x128xf32, #tpu.memory_space<vmem>>, vector<8x128xf32>,
    } else {
    }
    %c0 = arith.constant 0 : index
    %c0_1 = arith.constant 0 : index
    %3 = vector.load %arg2[%c0, %c0_1] : memref<16x128xf32, #tpu.memory_space<vmem>>, vector<16x128xf32>
    %c0_2 = arith.constant 0 : index
    %c0_3 = arith.constant 0 : index
    %4 = vector.load %arg3[%c0_2, %c0_3] : memref<16x128xf32, #tpu.memory_space<vmem>>, vector<16x128xf32>
    %5 = arith.subf %3, %4 : vector<16x128xf32>
    %c0_4 = arith.constant 0 : index
    %c0_5 = arith.constant 0 : index
    %6 = vector.load %arg4[%c0_4, %c0_5] : memref<16x128xf32, #tpu.memory_space<vmem>>, vector<16x128xf32>
    %7 = arith.subf %3, %6 : vector<16x128xf32>
    %8 = arith.mulf %5, %5 : vector<16x128xf32>
    %9 = arith.mulf %7, %7 : vector<16x128xf32>
    %c0_6 = arith.constant 0 : index
    %c0_7 = arith.constant 0 : index
    %10 = vector.load %arg6[%c0_6, %c0_7] : memref<8x128xf32, #tpu.memory_space<vmem>>, vector<8x128xf32>
    %11 = vector.shape_cast %8 : vector<16x128xf32> to vector<2x8x128xf32>
    %cst = arith.constant dense<0.000000e+00> : vector<8x128xf32>
    %12 = vector.multi_reduction <add>, %11, %cst [0] : vector<2x8x128xf32> to vector<8x128xf32>
    %13 = arith.addf %10, %12 : vector<8x128xf32>
    %c0_8 = arith.constant 0 : index
    %c0_9 = arith.constant 0 : index
    %14 = vector.load %arg6[%c0_8, %c0_9] : memref<8x128xf32, #tpu.memory_space<vmem>>, vector<8x128xf32>
    tpu.vector_store %arg6[%c0_8, %c0_9], %13 {strides = array<i32>} : memref<8x128xf32, #tpu.memory_space<vmem>>, vector<8x128xf32>,
    %c0_10 = arith.constant 0 : index
    %c0_11 = arith.constant 0 : index
    %15 = vector.load %arg7[%c0_10, %c0_11] : memref<8x128xf32, #tpu.memory_space<vmem>>, vector<8x128xf32>
    %16 = vector.shape_cast %9 : vector<16x128xf32> to vector<2x8x128xf32>
    %cst_12 = arith.constant dense<0.000000e+00> : vector<8x128xf32>
    %17 = vector.multi_reduction <add>, %16, %cst_12 [0] : vector<2x8x128xf32> to vector<8x128xf32>
    %18 = arith.addf %15, %17 : vector<8x128xf32>
    %c0_13 = arith.constant 0 : index
    %c0_14 = arith.constant 0 : index
    %19 = vector.load %arg7[%c0_13, %c0_14] : memref<8x128xf32, #tpu.memory_space<vmem>>, vector<8x128xf32>
    tpu.vector_store %arg7[%c0_13, %c0_14], %18 {strides = array<i32>} : memref<8x128xf32, #tpu.memory_space<vmem>>, vector<8x128xf32>,
    %c0_i32_15 = arith.constant 0 : i32
    %20 = arith.cmpi eq, %arg1, %c0_i32_15 : i32
    %21 = arith.extui %20 : i1 to i32
    %c0_i32_16 = arith.constant 0 : i32
    %22 = arith.cmpi ne, %21, %c0_i32_16 : i32
    scf.if %22 {
      %c0_17 = arith.constant 0 : index
      %c0_18 = arith.constant 0 : index
      %23 = vector.load %arg6[%c0_17, %c0_18] : memref<8x128xf32, #tpu.memory_space<vmem>>, vector<8x128xf32>
      %c0_19 = arith.constant 0 : index
      %c0_20 = arith.constant 0 : index
      %c0_21 = arith.constant 0 : index
      %24 = vector.load %arg5[%c0_19, %c0_20, %c0_21] : memref<1x16x128xf32, #tpu.memory_space<vmem>>, vector<1x8x128xf32>
      %25 = vector.shape_cast %24 : vector<1x8x128xf32> to vector<8x128xf32>
      %26 = vector.shape_cast %23 : vector<8x128xf32> to vector<1x8x128xf32>
      tpu.vector_store %arg5[%c0_19, %c0_20, %c0_21], %26 {strides = array<i32>} : memref<1x16x128xf32, #tpu.memory_space<vmem>>, vector<1x8x128xf32>,
      %c0_22 = arith.constant 0 : index
      %c0_23 = arith.constant 0 : index
      %27 = vector.load %arg7[%c0_22, %c0_23] : memref<8x128xf32, #tpu.memory_space<vmem>>, vector<8x128xf32>
      %c0_24 = arith.constant 0 : index
      %c8 = arith.constant 8 : index
      %c0_25 = arith.constant 0 : index
      %28 = vector.load %arg5[%c0_24, %c8, %c0_25] : memref<1x16x128xf32, #tpu.memory_space<vmem>>, vector<1x8x128xf32>
      %29 = vector.shape_cast %28 : vector<1x8x128xf32> to vector<8x128xf32>
      %30 = vector.shape_cast %27 : vector<8x128xf32> to vector<1x8x128xf32>
      tpu.vector_store %arg5[%c0_24, %c8, %c0_25], %30 {strides = array<i32>} : memref<1x16x128xf32, #tpu.memory_space<vmem>>, vector<1x8x128xf32>,
    } else {
    }
    return
  }
  func.func @transform_0(%arg0: i32, %arg1: i32) -> (i32, i32) {
    %c1_i32 = arith.constant 1 : i32
    %0 = arith.muli %arg0, %c1_i32 : i32
    %1 = arith.addi %0, %arg1 : i32
    %c0_i32 = arith.constant 0 : i32
    %c0_i32_0 = arith.constant 0 : i32
    return %1, %c0_i32 : i32, i32
  }
  func.func @transform_1(%arg0: i32, %arg1: i32) -> (i32, i32) {
    %c1_i32 = arith.constant 1 : i32
    %0 = arith.muli %arg0, %c1_i32 : i32
    %1 = arith.addi %0, %arg1 : i32
    %c0_i32 = arith.constant 0 : i32
    %c0_i32_0 = arith.constant 0 : i32
    return %1, %c0_i32 : i32, i32
  }
  func.func @transform_2(%arg0: i32, %arg1: i32) -> (i32, i32) {
    %c1_i32 = arith.constant 1 : i32
    %0 = arith.muli %arg0, %c1_i32 : i32
    %1 = arith.addi %0, %arg1 : i32
    %c0_i32 = arith.constant 0 : i32
    %c0_i32_0 = arith.constant 0 : i32
    return %1, %c0_i32 : i32, i32
  }
  func.func @transform_3(%arg0: i32, %arg1: i32) -> (i32, i32, i32) {
    %c0_i32 = arith.constant 0 : i32
    %c0_i32_0 = arith.constant 0 : i32
    %c0_i32_1 = arith.constant 0 : i32
    return %arg0, %c0_i32, %c0_i32_0 : i32, i32, i32
  }
}

</mosaic_0001>

<bundles_post_ra>
// kernel: triplet_loss_mean.1
= control target key start
LH: loop header
LB: loop body
LE: loop exit
PB: predicated region body
PF: predicated region fallthrough
CT: control target
= control target key end

     0   :  { %s181_s0 = inlined_call_operand.vmem [shape: f32[16,128], index: 0, kind: input, shape index: {}]   ;;  %s182_s1 = inlined_call_operand.vmem [shape: f32[16,128], index: 1, kind: input, shape index: {}]   ;;  %s183_s2 = inlined_call_operand.vmem [shape: f32[16,128], index: 2, kind: input, shape index: {}]   ;;  %s184_s3 = inlined_call_operand.vmem [shape: f32[1,16,128], index: 3, kind: output, shape index: {}]  }
   0x1   :  { %v86_v0 = vld [vmem:[%s181_s0] sm:$0xff]  ;;  %v87_v1 = vld [vmem:[%s181_s0 + $0x8] sm:$0xff] }
   0x2   :  { %v88_v2 = vld [vmem:[%s182_s1] sm:$0xff]  ;;  %v89_v3 = vld [vmem:[%s182_s1 + $0x8] sm:$0xff] }
   0x3   :  { %v90_v4 = vsub.f32 %v86_v0, %v88_v2  ;;  %v92_v5 = vld [vmem:[%s183_s2] sm:$0xff]  ;;  %v93_v6 = vld [vmem:[%s183_s2 + $0x8] sm:$0xff]  ;;  %v91_v7 = vsub.f32 %v87_v1, %v89_v3 }
   0x4   :  { %v94_v8 = vsub.f32 %v86_v0, %v92_v5  ;;  %v95_v9 = vsub.f32 %v87_v1, %v93_v6 }
   0x5   :  { %v96_v10 = vmul.f32 %v90_v4, %v90_v4  ;;  %v97_v11 = vmul.f32 %v91_v7, %v91_v7 }
   0x6   :  { %v98_v12 = vmul.f32 %v94_v8, %v94_v8  ;;  %v99_v13 = vmul.f32 %v95_v9, %v95_v9 }
   0x7   :  { %v101_v14 = vadd.f32 %v97_v11, %v96_v10 }
   0x8   :  { %v105_v15 = vadd.f32 %v99_v13, %v98_v12 }
   0x9   :  { %112 = vst [vmem:[%s184_s3] sm:$0xff] %v101_v14 }
   0xa   :  { %114 = vst [vmem:[%s184_s3 + $0x8] sm:$0xff] %v105_v15 }

</bundles_post_ra>
